<compile_context>
chip_gen: v7x
topology: tpu7x:2x2x1
jax: 0.10.0
libtpu: 0.0.40
codegen_flags: <defaults>
</compile_context>

<pallas_src>
import functools

import jax
import jax.numpy as jnp
from jax.experimental import pallas as pl
from jax.experimental.pallas import tpu as pltpu

BN_EPS = 1e-5


def _round_up(x, m):
    return (x + m - 1) // m * m


def _stats_kernel(a_ref, w_ref, stats_ref):
    """Pass 1: conv^T tile + per-channel partial BN statistics.

    a_ref:     [K, TM]       im2col^T tile (bf16)
    w_ref:     [Cout8, K]    weight matrix (bf16), VMEM-resident across tiles
    stats_ref: [Cout8, 128]  col 0 = per-channel sum, col 1 = sum of squares
    """
    c = jnp.dot(w_ref[...], a_ref[...], preferred_element_type=jnp.float32)
    # Zero-padded M columns contribute 0 to both sums, so dividing by the true
    # M later keeps the batch statistics exact.  Columns 2..127 of stats are
    # never read downstream, so they are intentionally left unwritten.
    stats_ref[:, 0:1] = jnp.sum(c, axis=1, keepdims=True)
    stats_ref[:, 1:2] = jnp.sum(c * c, axis=1, keepdims=True)


def _apply_kernel(a_ref, w_ref, scale_ref, shift_ref, o_ref):
    """Pass 2: recompute conv^T tile and apply fused BN scale/shift.

    o = (W @ A) * (gamma * inv_std) + (beta - mean * gamma * inv_std)
    All elementwise math in f32; cast only at the final store.
    """
    c = jnp.dot(w_ref[...], a_ref[...], preferred_element_type=jnp.float32)
    o_ref[...] = (c * scale_ref[...] + shift_ref[...]).astype(o_ref.dtype)


@functools.partial(
    jax.jit, static_argnames=("stride", "padding", "dilation", "tile_m")
)
def conv2d_batchnorm(
    x, weight, bias, gamma, beta, *, stride=1, padding=1, dilation=1, tile_m=512
):
    """Forward of conv2DBatchNorm.  x is NCHW, weight is [Cout, Cin, KH, KW].

    `bias` is accepted for API parity with nn.Conv2d(bias=True) but is a
    mathematical no-op under training-mode BatchNorm (cancelled exactly by the
    mean subtraction), so it is not added inside the kernels.
    """
    del bias  # exactly cancelled by BN mean subtraction (training mode)
    N, Cin, H, W = x.shape
    Cout, _, KH, KW = weight.shape
    OH = (H + 2 * padding - dilation * (KH - 1) - 1) // stride + 1
    OW = (W + 2 * padding - dilation * (KW - 1) - 1) // stride + 1
    M = N * OH * OW
    K = Cin * KH * KW

    Cout8 = _round_up(Cout, 8)                  # sublane-aligned channel axis
    tm = min(tile_m, _round_up(M, 128))         # lane-dense M tiles
    M_pad = _round_up(M, tm)
    num_m = M_pad // tm

    # ---- im2col^T (plain-JAX glue), channel-major, bf16, no K padding ------
    xp = jnp.pad(x, ((0, 0), (0, 0), (padding, padding), (padding, padding)))
    patches = []
    for kh in range(KH):
        for kw in range(KW):
            patches.append(
                xp[:, :,
                   kh * dilation:kh * dilation + stride * OH:stride,
                   kw * dilation:kw * dilation + stride * OW:stride]
            )  # [N, Cin, OH, OW]
    aT = jnp.stack(patches, axis=2)                      # [N, Cin, KH*KW, OH, OW]
    aT = aT.transpose(1, 2, 0, 3, 4).reshape(K, M)       # [K, M]  (matches weight order)
    aT = jnp.pad(aT, ((0, 0), (0, M_pad - M))).astype(jnp.bfloat16)

    wT = weight.reshape(Cout, K)                         # [Cout, K]
    wT = jnp.pad(wT, ((0, Cout8 - Cout), (0, 0))).astype(jnp.bfloat16)

    vmem_limit = 48 * 1024 * 1024  # fits v7x's 64 MiB/core with headroom

    # ---- pass 1: per-tile partial BN statistics (no conv round trip) -------
    stats = pl.pallas_call(
        _stats_kernel,
        out_shape=jax.ShapeDtypeStruct((num_m * Cout8, 128), jnp.float32),
        grid_spec=pltpu.PrefetchScalarGridSpec(
            num_scalar_prefetch=0,
            grid=(num_m,),
            in_specs=[
                pl.BlockSpec((K, tm), lambda i: (0, i)),        # A^T tile
                pl.BlockSpec((Cout8, K), lambda i: (0, 0)),     # W resident
            ],
            out_specs=pl.BlockSpec((Cout8, 128), lambda i: (i, 0)),
        ),
        compiler_params=pltpu.CompilerParams(
            dimension_semantics=("parallel",),
            vmem_limit_bytes=vmem_limit,
        ),
        cost_estimate=pl.CostEstimate(
            flops=2 * Cout8 * K * M_pad,
            transcendentals=0,
            bytes_accessed=2 * (K * M_pad + Cout8 * K)
            + 4 * num_m * Cout8 * 128,
        ),
    )(aT, wT)

    # ---- finalize BN statistics (tiny, plain-JAX glue) ----------------------
    stats = stats.reshape(num_m, Cout8, 128)
    tot_sum = jnp.sum(stats[:, :Cout, 0], axis=0)        # [Cout]
    tot_ssq = jnp.sum(stats[:, :Cout, 1], axis=0)        # [Cout]
    mean = tot_sum / M                                   # true M: pads add 0
    var = jnp.maximum(tot_ssq / M - mean * mean, 0.0)
    inv_std = jax.lax.rsqrt(var + BN_EPS)
    scale = gamma * inv_std
    shift = beta - mean * scale
    scale_col = jnp.pad(scale, (0, Cout8 - Cout)).reshape(Cout8, 1)
    scale_col = scale_col.astype(jnp.float32)
    shift_col = jnp.pad(shift, (0, Cout8 - Cout)).reshape(Cout8, 1)
    shift_col = shift_col.astype(jnp.float32)

    # ---- pass 2: recompute conv tile + fused scale/shift, lane-dense out ----
    outT = pl.pallas_call(
        _apply_kernel,
        out_shape=jax.ShapeDtypeStruct((Cout8, M_pad), x.dtype),
        grid_spec=pltpu.PrefetchScalarGridSpec(
            num_scalar_prefetch=0,
            grid=(num_m,),
            in_specs=[
                pl.BlockSpec((K, tm), lambda i: (0, i)),        # A^T tile
                pl.BlockSpec((Cout8, K), lambda i: (0, 0)),     # W resident
                pl.BlockSpec((Cout8, 1), lambda i: (0, 0)),     # scale
                pl.BlockSpec((Cout8, 1), lambda i: (0, 0)),     # shift
            ],
            out_specs=pl.BlockSpec((Cout8, tm), lambda i: (0, i)),
        ),
        compiler_params=pltpu.CompilerParams(
            dimension_semantics=("parallel",),
            vmem_limit_bytes=vmem_limit,
        ),
        cost_estimate=pl.CostEstimate(
            flops=2 * Cout8 * K * M_pad + 2 * Cout8 * M_pad,
            transcendentals=0,
            bytes_accessed=2 * (K * M_pad + Cout8 * K)
            + x.dtype.itemsize * Cout8 * M_pad,
        ),
    )(aT, wT, scale_col, shift_col)

    # [Cout8, M_pad] -> NCHW: slice pads, then a cheap leading-axis permute.
    return outT[:Cout, :M].reshape(Cout, N, OH, OW).transpose(1, 0, 2, 3)


def _reference(x, weight, bias, gamma, beta, stride=1, padding=1, dilation=1):
    """Plain-JAX reference: lax conv (with bias) + training-mode batch norm."""
    y = jax.lax.conv_general_dilated(
        x, weight,
        window_strides=(stride, stride),
        padding=((padding, padding), (padding, padding)),
        rhs_dilation=(dilation, dilation),
        dimension_numbers=("NCHW", "OIHW", "NCHW"),
    ) + bias.reshape(1, -1, 1, 1)
    mean = jnp.mean(y, axis=(0, 2, 3), keepdims=True)
    var = jnp.mean((y - mean) ** 2, axis=(0, 2, 3), keepdims=True)
    return (y - mean) * jax.lax.rsqrt(var + BN_EPS) * gamma.reshape(
        1, -1, 1, 1
    ) + beta.reshape(1, -1, 1, 1)


if __name__ == "__main__":
    # Module config: conv2DBatchNorm(in_channels=4, n_filters=8, k_size=3,
    #                                stride=1, padding=1, bias=True)
    N, Cin, H, W = 2, 4, 16, 16
    Cout, KH, KW = 8, 3, 3
    stride, padding = 1, 1

    key = jax.random.PRNGKey(0)
    kx, kw_, kb = jax.random.split(key, 3)

    x = jax.random.normal(kx, (N, Cin, H, W), dtype=jnp.float32)
    weight = jax.random.normal(kw_, (Cout, Cin, KH, KW), dtype=jnp.float32) * 0.1
    bias = jax.random.normal(kb, (Cout,), dtype=jnp.float32) * 0.1
    gamma = jnp.ones((Cout,), dtype=jnp.float32)   # BatchNorm2d weight init
    beta = jnp.zeros((Cout,), dtype=jnp.float32)   # BatchNorm2d bias init

    y = conv2d_batchnorm(x, weight, bias, gamma, beta,
                         stride=stride, padding=padding)
    y = jax.block_until_ready(y)

    y_ref = _reference(x, weight, bias, gamma, beta,
                       stride=stride, padding=padding)
    assert y.shape == (N, Cout, H, W), y.shape
    max_err = float(jnp.max(jnp.abs(y - y_ref)))
    # bf16 MXU operands with f32 accumulation: expected max abs error ~1e-2 on
    # the BN-standardized output, hence the relaxed (but still tight) bound.
    assert jnp.allclose(y, y_ref, atol=2e-2, rtol=2e-2), max_err

    print("KERNEL_OK")
</pallas_src>

<mosaic_0001>
module attributes {stable_mosaic.version = 11 : i64} {
  func.func @_stats_kernel(%arg0: i32, %arg1: memref<36x512xbf16, #tpu.memory_space<vmem>>, %arg2: memref<8x36xbf16, #tpu.memory_space<vmem>>, %arg3: memref<8x128xf32, #tpu.memory_space<vmem>>) attributes {dimension_semantics = [#tpu.dimension_semantics<parallel>], iteration_bounds = array<i64: 1>, scalar_prefetch = 0 : i64, scratch_operands = 0 : i64, tpu.core_type = #tpu.core_type<tc>, window_params = [{transform_indices = @transform_0, window_bounds = array<i64: 36, 512>}, {pipeline_mode = #tpu.pipeline_mode<synchronous>, transform_indices = @transform_1, window_bounds = array<i64: 8, 36>}, {transform_indices = @transform_2, window_bounds = array<i64: 8, 128>}]} {
    %c0 = arith.constant 0 : index
    %c0_0 = arith.constant 0 : index
    %0 = vector.load %arg2[%c0, %c0_0] : memref<8x36xbf16, #tpu.memory_space<vmem>>, vector<8x36xbf16>
    %c0_1 = arith.constant 0 : index
    %c0_2 = arith.constant 0 : index
    %1 = vector.load %arg1[%c0_1, %c0_2] : memref<36x512xbf16, #tpu.memory_space<vmem>>, vector<36x512xbf16>
    %cst = arith.constant dense<0.000000e+00> : vector<8x512xf32>
    %2 = tpu.matmul %0, %1, %cst {dimension_numbers = #tpu.dot_dimension_numbers<[1], [0], [0], [1], [0, 0, 1, 1], [], []>} : vector<8x36xbf16>, vector<36x512xbf16>, vector<8x512xf32> -> vector<8x512xf32>
    %cst_3 = arith.constant dense<0.000000e+00> : vector<8xf32>
    %3 = vector.multi_reduction <add>, %2, %cst_3 [1] : vector<8x512xf32> to vector<8xf32>
    %4 = vector.shape_cast %3 : vector<8xf32> to vector<8x1xf32>
    %c0_4 = arith.constant 0 : index
    %c0_5 = arith.constant 0 : index
    %5 = vector.load %arg3[%c0_4, %c0_5] : memref<8x128xf32, #tpu.memory_space<vmem>>, vector<8x1xf32>
    tpu.vector_store %arg3[%c0_4, %c0_5], %4 {strides = array<i32>} : memref<8x128xf32, #tpu.memory_space<vmem>>, vector<8x1xf32>,
    %6 = arith.mulf %2, %2 : vector<8x512xf32>
    %cst_6 = arith.constant dense<0.000000e+00> : vector<8xf32>
    %7 = vector.multi_reduction <add>, %6, %cst_6 [1] : vector<8x512xf32> to vector<8xf32>
    %8 = vector.shape_cast %7 : vector<8xf32> to vector<8x1xf32>
    %c0_7 = arith.constant 0 : index
    %c1 = arith.constant 1 : index
    %9 = vector.load %arg3[%c0_7, %c1] : memref<8x128xf32, #tpu.memory_space<vmem>>, vector<8x1xf32>
    tpu.vector_store %arg3[%c0_7, %c1], %8 {strides = array<i32>} : memref<8x128xf32, #tpu.memory_space<vmem>>, vector<8x1xf32>,
    return
  }
  func.func @transform_0(%arg0: i32) -> (i32, i32) {
    %c0_i32 = arith.constant 0 : i32
    %c0_i32_0 = arith.constant 0 : i32
    return %c0_i32, %arg0 : i32, i32
  }
  func.func @transform_1(%arg0: i32) -> (i32, i32) {
    %c0_i32 = arith.constant 0 : i32
    %c0_i32_0 = arith.constant 0 : i32
    %c0_i32_1 = arith.constant 0 : i32
    return %c0_i32, %c0_i32_0 : i32, i32
  }
  func.func @transform_2(%arg0: i32) -> (i32, i32) {
    %c0_i32 = arith.constant 0 : i32
    %c0_i32_0 = arith.constant 0 : i32
    return %arg0, %c0_i32 : i32, i32
  }
}

module attributes {stable_mosaic.version = 11 : i64} {
  func.func @_apply_kernel(%arg0: i32, %arg1: memref<36x512xbf16, #tpu.memory_space<vmem>>, %arg2: memref<8x36xbf16, #tpu.memory_space<vmem>>, %arg3: memref<8x1xf32, #tpu.memory_space<vmem>>, %arg4: memref<8x1xf32, #tpu.memory_space<vmem>>, %arg5: memref<8x512xf32, #tpu.memory_space<vmem>>) attributes {dimension_semantics = [#tpu.dimension_semantics<parallel>], iteration_bounds = array<i64: 1>, scalar_prefetch = 0 : i64, scratch_operands = 0 : i64, tpu.core_type = #tpu.core_type<tc>, window_params = [{transform_indices = @transform_0, window_bounds = array<i64: 36, 512>}, {pipeline_mode = #tpu.pipeline_mode<synchronous>, transform_indices = @transform_1, window_bounds = array<i64: 8, 36>}, {pipeline_mode = #tpu.pipeline_mode<synchronous>, transform_indices = @transform_2, window_bounds = array<i64: 8, 1>}, {pipeline_mode = #tpu.pipeline_mode<synchronous>, transform_indices = @transform_3, window_bounds = array<i64: 8, 1>}, {transform_indices = @transform_4, window_bounds = array<i64: 8, 512>}]} {
    %c0 = arith.constant 0 : index
    %c0_0 = arith.constant 0 : index
    %0 = vector.load %arg2[%c0, %c0_0] : memref<8x36xbf16, #tpu.memory_space<vmem>>, vector<8x36xbf16>
    %c0_1 = arith.constant 0 : index
    %c0_2 = arith.constant 0 : index
    %1 = vector.load %arg1[%c0_1, %c0_2] : memref<36x512xbf16, #tpu.memory_space<vmem>>, vector<36x512xbf16>
    %cst = arith.constant dense<0.000000e+00> : vector<8x512xf32>
    %2 = tpu.matmul %0, %1, %cst {dimension_numbers = #tpu.dot_dimension_numbers<[1], [0], [0], [1], [0, 0, 1, 1], [], []>} : vector<8x36xbf16>, vector<36x512xbf16>, vector<8x512xf32> -> vector<8x512xf32>
    %c0_3 = arith.constant 0 : index
    %c0_4 = arith.constant 0 : index
    %3 = vector.load %arg3[%c0_3, %c0_4] : memref<8x1xf32, #tpu.memory_space<vmem>>, vector<8x1xf32>
    %4 = vector.broadcast %3 : vector<8x1xf32> to vector<8x512xf32>
    %5 = arith.mulf %2, %4 : vector<8x512xf32>
    %c0_5 = arith.constant 0 : index
    %c0_6 = arith.constant 0 : index
    %6 = vector.load %arg4[%c0_5, %c0_6] : memref<8x1xf32, #tpu.memory_space<vmem>>, vector<8x1xf32>
    %7 = vector.broadcast %6 : vector<8x1xf32> to vector<8x512xf32>
    %8 = arith.addf %5, %7 : vector<8x512xf32>
    %c0_7 = arith.constant 0 : index
    %c0_8 = arith.constant 0 : index
    %9 = vector.load %arg5[%c0_7, %c0_8] : memref<8x512xf32, #tpu.memory_space<vmem>>, vector<8x512xf32>
    tpu.vector_store %arg5[%c0_7, %c0_8], %8 {strides = array<i32>} : memref<8x512xf32, #tpu.memory_space<vmem>>, vector<8x512xf32>,
    return
  }
  func.func @transform_0(%arg0: i32) -> (i32, i32) {
    %c0_i32 = arith.constant 0 : i32
    %c0_i32_0 = arith.constant 0 : i32
    return %c0_i32, %arg0 : i32, i32
  }
  func.func @transform_1(%arg0: i32) -> (i32, i32) {
    %c0_i32 = arith.constant 0 : i32
    %c0_i32_0 = arith.constant 0 : i32
    %c0_i32_1 = arith.constant 0 : i32
    return %c0_i32, %c0_i32_0 : i32, i32
  }
  func.func @transform_2(%arg0: i32) -> (i32, i32) {
    %c0_i32 = arith.constant 0 : i32
    %c0_i32_0 = arith.constant 0 : i32
    %c0_i32_1 = arith.constant 0 : i32
    return %c0_i32, %c0_i32_0 : i32, i32
  }
  func.func @transform_3(%arg0: i32) -> (i32, i32) {
    %c0_i32 = arith.constant 0 : i32
    %c0_i32_0 = arith.constant 0 : i32
    %c0_i32_1 = arith.constant 0 : i32
    return %c0_i32, %c0_i32_0 : i32, i32
  }
  func.func @transform_4(%arg0: i32) -> (i32, i32) {
    %c0_i32 = arith.constant 0 : i32
    %c0_i32_0 = arith.constant 0 : i32
    return %c0_i32, %arg0 : i32, i32
  }
}

</mosaic_0001>

<bundles_post_ra>
// kernel: conv2d_batchnorm.2
= control target key start
LH: loop header
LB: loop body
LE: loop exit
PB: predicated region body
PF: predicated region fallthrough
CT: control target
= control target key end

     0   :  { %v227_v1 = vmov 0   ;;  %vm77_vm0 = vcmask 1041408   ;;  %vm73_vm1 = vcmask 293888   ;;  %vm177_vm2 = vcmask 7168   ;;  %s282_s0 = inlined_call_operand.vmem [shape: bf16[36,512], index: 0, kind: input, shape index: {}]   ;;  %s283_s1 = inlined_call_operand.vmem [shape: bf16[8,36], index: 1, kind: input, shape index: {}]   ;;  %s284_s2 = inlined_call_operand.vmem [shape: f32[8,128], index: 2, kind: output, shape index: {}]  }
   0x1   :  { %v211_v0 = vld [vmem:[%s282_s0 + $0x4] ss:$16 sps:$4 sm:$0xff]   ;;  %122 = vmatprep.mubr.bf16.mxu0 %v227_v1  ;;  %163 = vmatprep.mubr.bf16.mxu1 %v227_v1  ;;  %v213_v2 = vld [vmem:[%s282_s0 + $0xc] ss:$16 sps:$4 sm:$0xff]   ;;  %v215_v3 = vld [vmem:[%s282_s0] ss:$16 sps:$4 sm:$0xff]  }
   0x2   :  { %90 = vmatprep.subr.bf16.mxu0 %v211_v0  ;;  %v216_v4 = vld [vmem:[%s282_s0 + $0x8] ss:$16 sps:$4 sm:$0xff]   ;;  %131 = vmatprep.subr.bf16.mxu1 %v213_v2  ;;  %v217_v5 = vld [vmem:[%s282_s0 + $0x24] ss:$16 sps:$4 sm:$0xff]   ;;  %v219_v6 = vld [vmem:[%s282_s0 + $0x2c] ss:$16 sps:$4 sm:$0xff]  }
   0x3   :  { %91 = vmatpush1.bf16.msra.mxu0 %v215_v3  ;;  %132 = vmatpush1.bf16.msra.mxu1 %v216_v4  ;;  %v221_v7 = vld [vmem:[%s282_s0 + $0x20] ss:$16 sps:$4 sm:$0xff]   ;;  %v222_v8 = vld [vmem:[%s282_s0 + $0x28] ss:$16 sps:$4 sm:$0xff]   ;;  %vm188_vm3 = vcmask 15368  }
   0x4   :  { %92 = vmatprep.subr.bf16.mxu0 %v217_v5  ;;  %v21_v9 = vld [vmem:[%s282_s0 + $0x40] sm:$0x33]  ;;  %v22_v10 = vld [vmem:[%s282_s0 + $0x48] sm:$0x33]  ;;  %133 = vmatprep.subr.bf16.mxu1 %v219_v6 }
   0x5   :  { %v203_v11 = vcombine.high %v21_v9, %v21_v9  ;;  %v205_v12 = vcombine.high %v22_v10, %v22_v10  ;;  %v202_v13 = vcombine.low %v21_v9, %v21_v9  ;;  %v204_v14 = vcombine.low %v22_v10, %v22_v10  ;;  %v12_v17 = vld [vmem:[%s283_s1] sm:$0xf] }
   0x7   :  { %93 = vmatpush1.bf16.msra.mxu0 %v221_v7  ;;  %134 = vmatpush1.bf16.msra.mxu1 %v222_v8  ;;  %v79_v15 = vsel %vm77_vm0, %v202_v13, 0  ;;  %v85_v16 = vsel %vm77_vm0, %v204_v14, 0 }
   0x8   :  { %206 = vmatprep.subr.msk.bf16.mxu0 %vm77_vm0, %v203_v11  ;;  %208 = vmatprep.subr.msk.bf16.mxu1 %vm77_vm0, %v205_v12 }
   0xb   :  { %95 = vmatpush1.bf16.msra.mxu0 %v79_v15  ;;  %136 = vmatpush1.bf16.msra.mxu1 %v85_v16 }
   0xe   :  { %207 = vmatmul.mubr.msk.bf16.vlgmr.msra.gmra.mrb[0].mxu0 %vm73_vm1, %v12_v17  ;;  %209 = vmatmul.mubr.msk.bf16.vlgmr.msra.gmra.mrb[0].mxu1 %vm73_vm1, %v12_v17 }
  0xe1   :  { %v124_v18 = vpop.f32.mrb[0].mxu0  ;;  %v165_v19 = vpop.f32.mrb[0].mxu1 }
  0xe2   :  { %v179_v20 = vmul.f32 %v124_v18, %v124_v18  ;;  %v126_v21 = vpop.f32.mrb[1].mxu0  ;;  %v167_v22 = vpop.f32.mrb[1].mxu1  ;;  %v181_v23 = vmul.f32 %v165_v19, %v165_v19 }
  0xe3   :  { %v172_v24 = vadd.f32 %v126_v21, %v124_v18  ;;  %v180_v25 = vmul.f32 %v126_v21, %v126_v21  ;;  %v128_v26 = vpop.f32.mrb[2].mxu0  ;;  %v169_v27 = vpop.f32.mrb[2].mxu1  ;;  %v182_v32 = vmul.f32 %v167_v22, %v167_v22 }
  0xe4   :  { %v129_v28 = vpop.f32.mrb[3].mxu0  ;;  %v170_v29 = vpop.f32.mrb[3].mxu1 }
  0xe5   :  { %v183_v30 = vadd.f32 %v180_v25, %v179_v20  ;;  %v173_v31 = vadd.f32 %v172_v24, %v165_v19 }
  0xe7   :  { %v174_v33 = vadd.f32 %v173_v31, %v167_v22  ;;  %v184_v34 = vadd.f32 %v183_v30, %v181_v23 }
  0xe9   :  { %175 = vadd.xlane.f32.xlu0 %v174_v33  ;;  %v185_v35 = vadd.f32 %v184_v34, %v182_v32 }
  0xed   :  { %186 = vadd.xlane.f32.xlu0 %v185_v35 }
 0x176   :  { %v176_v36 = vpop.xlane.xlu0 %175 }
 0x177   :  { %178 = vst.msk [vmem:[%s284_s2] sm:$0xff] %vm177_vm2, %v176_v36 }
 0x17a   :  { %v187_v37 = vpop.xlane.xlu0 %186 }
 0x17b   :  { %189 = vst.msk [vmem:[%s284_s2] sm:$0xff] %vm188_vm3, %v187_v37 }

// kernel: conv2d_batchnorm.3
= control target key start
LH: loop header
LB: loop body
LE: loop exit
PB: predicated region body
PF: predicated region fallthrough
CT: control target
= control target key end

     0   :  { %v240_v1 = vmov 0   ;;  %vm83_vm0 = vcmask 1041408   ;;  %vm79_vm1 = vcmask 293888   ;;  %s321_s0 = inlined_call_operand.vmem [shape: bf16[36,512], index: 0, kind: input, shape index: {}]   ;;  %s322_s2 = inlined_call_operand.vmem [shape: f32[8,1], index: 2, kind: input, shape index: {}]   ;;  %s323_s3 = inlined_call_operand.vmem [shape: f32[8,1], index: 3, kind: input, shape index: {}]   ;;  %s324_s1 = inlined_call_operand.vmem [shape: bf16[8,36], index: 1, kind: input, shape index: {}]   ;;  %s325_s4 = inlined_call_operand.vmem [shape: f32[8,512], index: 4, kind: output, shape index: {}]  }
   0x1   :  { %v224_v0 = vld [vmem:[%s321_s0 + $0x4] ss:$16 sps:$4 sm:$0xff]   ;;  %128 = vmatprep.mubr.bf16.mxu0 %v240_v1  ;;  %169 = vmatprep.mubr.bf16.mxu1 %v240_v1  ;;  %v226_v2 = vld [vmem:[%s321_s0 + $0xc] ss:$16 sps:$4 sm:$0xff]   ;;  %v228_v3 = vld [vmem:[%s321_s0] ss:$16 sps:$4 sm:$0xff]  }
   0x2   :  { %223 = vset.pattern.permute.xlu0 %v240_v1  ;;  %96 = vmatprep.subr.bf16.mxu0 %v224_v0  ;;  %v229_v4 = vld [vmem:[%s321_s0 + $0x8] ss:$16 sps:$4 sm:$0xff]   ;;  %v230_v5 = vld [vmem:[%s321_s0 + $0x24] ss:$16 sps:$4 sm:$0xff]   ;;  %v232_v6 = vld [vmem:[%s321_s0 + $0x2c] ss:$16 sps:$4 sm:$0xff]  }
   0x3   :  { %137 = vmatprep.subr.bf16.mxu1 %v226_v2  ;;  %97 = vmatpush1.bf16.msra.mxu0 %v228_v3  ;;  %v234_v7 = vld [vmem:[%s321_s0 + $0x20] ss:$16 sps:$4 sm:$0xff]   ;;  %v235_v8 = vld [vmem:[%s321_s0 + $0x28] ss:$16 sps:$4 sm:$0xff]  }
   0x4   :  { %138 = vmatpush1.bf16.msra.mxu1 %v229_v4  ;;  %98 = vmatprep.subr.bf16.mxu0 %v230_v5  ;;  %v27_v9 = vld [vmem:[%s321_s0 + $0x40] sm:$0x33]  ;;  %v28_v10 = vld [vmem:[%s321_s0 + $0x48] sm:$0x33] }
   0x5   :  { %139 = vmatprep.subr.bf16.mxu1 %v232_v6  ;;  %v215_v11 = vcombine.high %v27_v9, %v27_v9  ;;  %v217_v12 = vcombine.high %v28_v10, %v28_v10  ;;  %v214_v13 = vcombine.low %v27_v9, %v27_v9  ;;  %v216_v14 = vcombine.low %v28_v10, %v28_v10  ;;  %v178_v15 = vld [vmem:[%s322_s2] sm:$0xff] }
   0x6   :  { %181 = vperm.xlu0 %223, %v178_v15   ;;  %v188_v16 = vld [vmem:[%s323_s3] sm:$0xff] }
   0x7   :  { %99 = vmatpush1.bf16.msra.mxu0 %v234_v7  ;;  %v85_v17 = vsel %vm83_vm0, %v214_v13, 0  ;;  %v91_v18 = vsel %vm83_vm0, %v216_v14, 0  ;;  %v18_v19 = vld [vmem:[%s324_s1] sm:$0xf] }
   0x8   :  { %140 = vmatpush1.bf16.msra.mxu1 %v235_v8  ;;  %218 = vmatprep.subr.msk.bf16.mxu0 %vm83_vm0, %v215_v11 }
   0x9   :  { %220 = vmatprep.subr.msk.bf16.mxu1 %vm83_vm0, %v217_v12 }
   0xa   :  { %191 = vperm.xlu0 %223, %v188_v16  }
   0xb   :  { %101 = vmatpush1.bf16.msra.mxu0 %v85_v17 }
   0xc   :  { %142 = vmatpush1.bf16.msra.mxu1 %v91_v18 }
   0xe   :  { %219 = vmatmul.mubr.msk.bf16.vlgmr.msra.gmra.mrb[0].mxu0 %vm79_vm1, %v18_v19 }
   0xf   :  { %221 = vmatmul.mubr.msk.bf16.vlgmr.msra.gmra.mrb[0].mxu1 %vm79_vm1, %v18_v19 }
  0x85   :  { %v182_v20 = vpop.permute.xlu0 %181 }
  0x89   :  { %v192_v21 = vpop.permute.xlu0 %191 }
  0xe1   :  { %v130_v22 = vpop.f32.mrb[0].mxu0 }
  0xe2   :  { %v171_v23 = vpop.f32.mrb[0].mxu1  ;;  %v184_v24 = vmul.f32 %v182_v20, %v130_v22  ;;  %v132_v26 = vpop.f32.mrb[1].mxu0 }
  0xe3   :  { %v186_v25 = vmul.f32 %v182_v20, %v171_v23  ;;  %v173_v27 = vpop.f32.mrb[1].mxu1  ;;  %v185_v28 = vmul.f32 %v182_v20, %v132_v26  ;;  %v134_v30 = vpop.f32.mrb[2].mxu0 }
  0xe4   :  { %v187_v29 = vmul.f32 %v182_v20, %v173_v27  ;;  %v175_v31 = vpop.f32.mrb[2].mxu1  ;;  %v194_v32 = vadd.f32 %v192_v21, %v184_v24  ;;  %v135_v34 = vpop.f32.mrb[3].mxu0 }
  0xe5   :  { %v196_v33 = vadd.f32 %v192_v21, %v186_v25  ;;  %v176_v35 = vpop.f32.mrb[3].mxu1  ;;  %v195_v36 = vadd.f32 %v192_v21, %v185_v28 }
  0xe6   :  { %v197_v37 = vadd.f32 %v192_v21, %v187_v29  ;;  %198 = vst [vmem:[%s325_s4] sm:$0xff] %v194_v32 }
  0xe7   :  { %200 = vst [vmem:[%s325_s4 + $0x10] sm:$0xff] %v196_v33  ;;  %199 = vst [vmem:[%s325_s4 + $0x8] sm:$0xff] %v195_v36 }
  0xe8   :  { %201 = vst [vmem:[%s325_s4 + $0x18] sm:$0xff] %v197_v37 }

</bundles_post_ra>
